<compile_context>
chip_gen: v6e
topology: v6e:2x2x1
jax: 0.10.0
libtpu: 0.0.40
codegen_flags: <defaults>
</compile_context>

<pallas_src>
import numpy as np
import jax
import jax.numpy as jnp
from jax import lax
from jax.experimental import pallas as pl
from jax.experimental.pallas import tpu as pltpu

# ---- block config (ResNeXt ResidualBlock, in_stride=1, projection='B') ----
CIN = 8               # input_channels
CARD = 2              # cardinality
INNER = 8             # inner_width
CW = CARD * INNER     # in_width = 16
COUT = 16             # output_channels
N, H, W = 32, 8, 8    # batched so ROWS = N*H = 256 fills the MXU / both TCs
ROWS = N * H          # 256
LANES_IN = W * CIN    # 64
LANES_MID = W * CW    # 128
LANES_OUT = W * COUT  # 128
TILE_ROWS = 128       # rows per grid step (multiple of H; fits MXU M dim)
EPS = 1e-5


# ------------------------- fused per-row-tile kernel ------------------------
def _block_kernel(x_ref, s0_ref, b0_ref, w1_ref, s1_ref, b1_ref,
                  w2_ref, s2_ref, b2_ref, w3s_ref, o_ref):
    tile_rows = x_ref.shape[0]

    # BN0 + ReLU (f32 on the VPU; bf16 only right before dots -> v5e friendly)
    x0 = jnp.maximum(x_ref[...] * s0_ref[...] + b0_ref[...], 0.0)
    x0b = x0.astype(jnp.bfloat16)

    # 1x1 conv (block-diag kron(I_W, w1)) + BN1 + ReLU   -> (tile, 128)
    y1 = jnp.dot(x0b, w1_ref[...], preferred_element_type=jnp.float32)
    y1 = jnp.maximum(y1 * s1_ref[...] + b1_ref[...], 0.0)

    # 3x3 grouped conv, padding=1:
    #   H direction: XLU sublane roll + boundary mask (image-top/bottom rows
    #   zeroed; tiles are whole images so circular wrap is always masked).
    #   W direction + cardinality groups: folded into the block-banded weight.
    #   All three dy taps collapse into ONE K=384 MXU dot.
    h_idx = lax.broadcasted_iota(jnp.int32, (tile_rows, LANES_MID), 0) % H
    y1_up = jnp.where(h_idx >= 1, pltpu.roll(y1, shift=1, axis=0), 0.0)
    y1_dn = jnp.where(h_idx <= H - 2,
                      pltpu.roll(y1, shift=tile_rows - 1, axis=0), 0.0)
    y1cat = jnp.concatenate([y1_up, y1, y1_dn], axis=1).astype(jnp.bfloat16)
    y2 = jnp.dot(y1cat, w2_ref[...], preferred_element_type=jnp.float32)
    y2 = jnp.maximum(y2 * s2_ref[...] + b2_ref[...], 0.0)

    # final 1x1 conv + identity skip (channel zero-pad as 0/1 projection),
    # fused into a single K=192 dot with the stacked [w3big; pskip] weight.
    y2cat = jnp.concatenate([y2.astype(jnp.bfloat16), x0b], axis=1)
    o_ref[...] = jnp.dot(y2cat, w3s_ref[...],
                         preferred_element_type=jnp.float32)


def resnext_block_forward(x_nhwc, params, *, tile_rows=TILE_ROWS):
    (s0w, b0w, w1big, s1w, b1w, w2stack, s2w, b2w, w3skip) = params
    n, h, w, c = x_nhwc.shape
    assert (c, h, w) == (CIN, H, W)
    rows = n * h
    tile_rows = min(tile_rows, rows)
    assert rows % tile_rows == 0 and tile_rows % H == 0

    x_wide = x_nhwc.reshape(rows, LANES_IN)

    def row_spec(lanes):
        return pl.BlockSpec((tile_rows, lanes), lambda i: (i, 0))

    def whole(a):  # constant block index -> DMA'd once, VMEM-resident
        return pl.BlockSpec(a.shape, lambda i: (0, 0))

    out_wide = pl.pallas_call(
        _block_kernel,
        out_shape=jax.ShapeDtypeStruct((rows, LANES_OUT), jnp.float32),
        grid=(rows // tile_rows,),
        in_specs=[row_spec(LANES_IN), whole(s0w), whole(b0w), whole(w1big),
                  whole(s1w), whole(b1w), whole(w2stack), whole(s2w),
                  whole(b2w), whole(w3skip)],
        out_specs=row_spec(LANES_OUT),
        compiler_params=pltpu.CompilerParams(
            dimension_semantics=("parallel",)),
    )(x_wide, s0w, b0w, w1big, s1w, b1w, w2stack, s2w, b2w, w3skip)
    return out_wide.reshape(n, h, w, COUT)


# ----------------- host-side weight rearrangement (one-time) ----------------
def prepare_params(s0, b0, s1, b1, s2, b2, w1_t, w2_t, w3_t):
    bf = jnp.bfloat16
    # 1x1 convs -> block-diag kron(I_W, w); skip -> 0/1 channel projection
    w1 = jnp.transpose(w1_t[:, :, 0, 0])                      # (CIN, CW)
    w3 = jnp.transpose(w3_t[:, :, 0, 0])                      # (CW, COUT)
    eye_w = jnp.eye(W, dtype=jnp.float32)
    w1big = jnp.kron(eye_w, w1)                                # (64, 128)
    w3big = jnp.kron(eye_w, w3)                                # (128, 128)
    pskip = jnp.kron(eye_w, jnp.eye(CIN, COUT, dtype=jnp.float32))  # (64,128)
    w3skip = jnp.concatenate([w3big, pskip], axis=0)           # (192, 128)

    # 3x3 grouped conv -> per-dy block-banded over W (+ group structure),
    # vertically stacked so the dy sum becomes one K = 3*W*CW dot.
    gin = CW // CARD
    w2_np = np.asarray(w2_t)                                   # (CW,gin,3,3)
    w2_dense = np.zeros((3, 3, CW, CW), np.float32)
    for co in range(CW):
        g = co // gin
        w2_dense[:, :, g * gin:(g + 1) * gin, co] = np.transpose(
            w2_np[co], (1, 2, 0))
    w2big = np.zeros((3, LANES_MID, LANES_MID), np.float32)
    for dy in range(3):
        for j in range(W):
            for dx in range(3):
                jp = j + dx - 1
                if 0 <= jp < W:
                    w2big[dy, jp * CW:(jp + 1) * CW,
                          j * CW:(j + 1) * CW] = w2_dense[dy, dx]
    w2stack = jnp.asarray(w2big.reshape(3 * LANES_MID, LANES_MID))  # (384,128)

    def widen(v):  # lane = j*C + c
        return jnp.tile(v, W).reshape(1, -1).astype(jnp.float32)

    return (widen(s0), widen(b0), w1big.astype(bf), widen(s1), widen(b1),
            w2stack.astype(bf), widen(s2), widen(b2), w3skip.astype(bf))


# ----------------------------- pure-JAX reference --------------------------
def reference(x, s0, b0, w1_t, s1, b1, w2_t, s2, b2, w3_t):
    dn = ('NHWC', 'HWIO', 'NHWC')
    hp = lax.Precision.HIGHEST
    x0 = jnp.maximum(x * s0 + b0, 0.0)
    y1 = lax.conv_general_dilated(x0, jnp.transpose(w1_t, (2, 3, 1, 0)),
                                  (1, 1), 'VALID', dimension_numbers=dn,
                                  precision=hp)
    y1 = jnp.maximum(y1 * s1 + b1, 0.0)
    y2 = lax.conv_general_dilated(y1, jnp.transpose(w2_t, (2, 3, 1, 0)),
                                  (1, 1), ((1, 1), (1, 1)),
                                  dimension_numbers=dn,
                                  feature_group_count=CARD, precision=hp)
    y2 = jnp.maximum(y2 * s2 + b2, 0.0)
    y3 = lax.conv_general_dilated(y2, jnp.transpose(w3_t, (2, 3, 1, 0)),
                                  (1, 1), 'VALID', dimension_numbers=dn,
                                  precision=hp)
    skip = jnp.pad(x0, ((0, 0), (0, 0), (0, 0), (0, COUT - CIN)))
    return y3 + skip


if __name__ == "__main__":
    keys = jax.random.split(jax.random.PRNGKey(0), 8)
    x = jax.random.normal(keys[0], (N, H, W, CIN), dtype=jnp.float32)

    def bn_fold(k, c):
        kg, kb, km, kv = jax.random.split(k, 4)
        gamma = jax.random.uniform(kg, (c,), minval=0.5, maxval=1.5)
        beta = 0.1 * jax.random.normal(kb, (c,))
        mean = 0.1 * jax.random.normal(km, (c,))
        var = jax.random.uniform(kv, (c,), minval=0.5, maxval=1.5)
        scale = gamma * lax.rsqrt(var + EPS)
        bias = beta - mean * scale
        return scale.astype(jnp.float32), bias.astype(jnp.float32)

    s0, b0 = bn_fold(keys[1], CIN)
    s1, b1 = bn_fold(keys[2], CW)
    s2, b2 = bn_fold(keys[3], CW)

    # torch-shaped conv weights (OIHW), bias=False
    w1_t = 0.1 * jax.random.normal(keys[4], (CW, CIN, 1, 1), dtype=jnp.float32)
    w2_t = 0.1 * jax.random.normal(keys[5], (CW, CW // CARD, 3, 3),
                                   dtype=jnp.float32)
    w3_t = 0.1 * jax.random.normal(keys[6], (COUT, CW, 1, 1),
                                   dtype=jnp.float32)

    params = prepare_params(s0, b0, s1, b1, s2, b2, w1_t, w2_t, w3_t)
    out = jax.block_until_ready(resnext_block_forward(x, params))
    ref = jax.block_until_ready(
        reference(x, s0, b0, w1_t, s1, b1, w2_t, s2, b2, w3_t))

    assert out.shape == (N, H, W, COUT)
    # tolerance loosened vs the f32 reference: dot operands are bf16 (MXU)
    if not np.allclose(np.asarray(out), np.asarray(ref), atol=5e-2, rtol=5e-2):
        err = np.max(np.abs(np.asarray(out) - np.asarray(ref)))
        raise AssertionError(f"Pallas output mismatch, max abs err {err}")
    print("KERNEL_OK")
</pallas_src>

<mosaic_0001>
module attributes {stable_mosaic.version = 11 : i64} {
  func.func @_block_kernel(%arg0: i32, %arg1: memref<128x64xf32, #tpu.memory_space<vmem>>, %arg2: memref<1x64xf32, #tpu.memory_space<vmem>>, %arg3: memref<1x64xf32, #tpu.memory_space<vmem>>, %arg4: memref<64x128xbf16, #tpu.memory_space<vmem>>, %arg5: memref<1x128xf32, #tpu.memory_space<vmem>>, %arg6: memref<1x128xf32, #tpu.memory_space<vmem>>, %arg7: memref<384x128xbf16, #tpu.memory_space<vmem>>, %arg8: memref<1x128xf32, #tpu.memory_space<vmem>>, %arg9: memref<1x128xf32, #tpu.memory_space<vmem>>, %arg10: memref<192x128xbf16, #tpu.memory_space<vmem>>, %arg11: memref<128x128xf32, #tpu.memory_space<vmem>>) attributes {dimension_semantics = [#tpu.dimension_semantics<parallel>], iteration_bounds = array<i64: 2>, scalar_prefetch = 0 : i64, scratch_operands = 0 : i64, tpu.core_type = #tpu.core_type<tc>, window_params = [{transform_indices = @transform_0, window_bounds = array<i64: 128, 64>}, {pipeline_mode = #tpu.pipeline_mode<synchronous>, transform_indices = @transform_1, window_bounds = array<i64: 1, 64>}, {pipeline_mode = #tpu.pipeline_mode<synchronous>, transform_indices = @transform_2, window_bounds = array<i64: 1, 64>}, {pipeline_mode = #tpu.pipeline_mode<synchronous>, transform_indices = @transform_3, window_bounds = array<i64: 64, 128>}, {pipeline_mode = #tpu.pipeline_mode<synchronous>, transform_indices = @transform_4, window_bounds = array<i64: 1, 128>}, {pipeline_mode = #tpu.pipeline_mode<synchronous>, transform_indices = @transform_5, window_bounds = array<i64: 1, 128>}, {pipeline_mode = #tpu.pipeline_mode<synchronous>, transform_indices = @transform_6, window_bounds = array<i64: 384, 128>}, {pipeline_mode = #tpu.pipeline_mode<synchronous>, transform_indices = @transform_7, window_bounds = array<i64: 1, 128>}, {pipeline_mode = #tpu.pipeline_mode<synchronous>, transform_indices = @transform_8, window_bounds = array<i64: 1, 128>}, {pipeline_mode = #tpu.pipeline_mode<synchronous>, transform_indices = @transform_9, window_bounds = array<i64: 192, 128>}, {transform_indices = @transform_10, window_bounds = array<i64: 128, 128>}]} {
    %c0 = arith.constant 0 : index
    %c0_0 = arith.constant 0 : index
    %0 = vector.load %arg1[%c0, %c0_0] : memref<128x64xf32, #tpu.memory_space<vmem>>, vector<128x64xf32>
    %c0_1 = arith.constant 0 : index
    %c0_2 = arith.constant 0 : index
    %1 = vector.load %arg2[%c0_1, %c0_2] : memref<1x64xf32, #tpu.memory_space<vmem>>, vector<1x64xf32>
    %2 = vector.broadcast %1 : vector<1x64xf32> to vector<128x64xf32>
    %3 = arith.mulf %0, %2 : vector<128x64xf32>
    %c0_3 = arith.constant 0 : index
    %c0_4 = arith.constant 0 : index
    %4 = vector.load %arg3[%c0_3, %c0_4] : memref<1x64xf32, #tpu.memory_space<vmem>>, vector<1x64xf32>
    %5 = vector.broadcast %4 : vector<1x64xf32> to vector<128x64xf32>
    %6 = arith.addf %3, %5 : vector<128x64xf32>
    %cst = arith.constant 0.000000e+00 : f32
    %7 = vector.broadcast %cst : f32 to vector<128x64xf32>
    %8 = arith.maximumf %6, %7 : vector<128x64xf32>
    %9 = arith.truncf %8 : vector<128x64xf32> to vector<128x64xbf16>
    %c0_5 = arith.constant 0 : index
    %c0_6 = arith.constant 0 : index
    %10 = vector.load %arg4[%c0_5, %c0_6] : memref<64x128xbf16, #tpu.memory_space<vmem>>, vector<64x128xbf16>
    %cst_7 = arith.constant dense<0.000000e+00> : vector<128x128xf32>
    %11 = tpu.matmul %9, %10, %cst_7 {dimension_numbers = #tpu.dot_dimension_numbers<[1], [0], [0], [1], [0, 0, 1, 1], [], []>} : vector<128x64xbf16>, vector<64x128xbf16>, vector<128x128xf32> -> vector<128x128xf32>
    %c0_8 = arith.constant 0 : index
    %c0_9 = arith.constant 0 : index
    %12 = vector.load %arg5[%c0_8, %c0_9] : memref<1x128xf32, #tpu.memory_space<vmem>>, vector<1x128xf32>
    %13 = vector.broadcast %12 : vector<1x128xf32> to vector<128x128xf32>
    %14 = arith.mulf %11, %13 : vector<128x128xf32>
    %c0_10 = arith.constant 0 : index
    %c0_11 = arith.constant 0 : index
    %15 = vector.load %arg6[%c0_10, %c0_11] : memref<1x128xf32, #tpu.memory_space<vmem>>, vector<1x128xf32>
    %16 = vector.broadcast %15 : vector<1x128xf32> to vector<128x128xf32>
    %17 = arith.addf %14, %16 : vector<128x128xf32>
    %cst_12 = arith.constant 0.000000e+00 : f32
    %18 = vector.broadcast %cst_12 : f32 to vector<128x128xf32>
    %19 = arith.maximumf %17, %18 : vector<128x128xf32>
    %20 = tpu.iota {dimensions = array<i32: 0>} : vector<128x128xi32>
    %c8_i32 = arith.constant 8 : i32
    %c0_i32 = arith.constant 0 : i32
    %21 = arith.cmpi eq, %c8_i32, %c0_i32 : i32
    %c1_i32 = arith.constant 1 : i32
    %22 = arith.select %21, %c1_i32, %c8_i32 : i32
    %23 = vector.broadcast %22 : i32 to vector<128x128xi32>
    %24 = arith.remsi %20, %23 : vector<128x128xi32>
    %c0_i32_13 = arith.constant 0 : i32
    %25 = vector.broadcast %c0_i32_13 : i32 to vector<128x128xi32>
    %26 = arith.cmpi ne, %24, %25 : vector<128x128xi32>
    %c0_i32_14 = arith.constant 0 : i32
    %27 = vector.broadcast %c0_i32_14 : i32 to vector<128x128xi32>
    %28 = arith.cmpi slt, %24, %27 : vector<128x128xi32>
    %c0_i32_15 = arith.constant 0 : i32
    %29 = arith.cmpi slt, %22, %c0_i32_15 : i32
    %30 = vector.broadcast %29 : i1 to vector<128x128xi1>
    %31 = vector.broadcast %30 : vector<128x128xi1> to vector<128x128xi1>
    %32 = arith.xori %28, %31 : vector<128x128xi1>
    %33 = arith.andi %32, %26 : vector<128x128xi1>
    %34 = vector.broadcast %22 : i32 to vector<128x128xi32>
    %35 = arith.addi %24, %34 : vector<128x128xi32>
    %36 = arith.select %33, %35, %24 : vector<128x128xi1>, vector<128x128xi32>
    %c1_i32_16 = arith.constant 1 : i32
    %37 = vector.broadcast %c1_i32_16 : i32 to vector<128x128xi32>
    %38 = arith.cmpi sge, %36, %37 : vector<128x128xi32>
    %c1_i32_17 = arith.constant 1 : i32
    %39 = tpu.dynamic_rotate %19 by %c1_i32_17 dim 0 : vector<128x128xf32>, i32 -> vector<128x128xf32>
    %cst_18 = arith.constant 0.000000e+00 : f32
    %40 = vector.broadcast %cst_18 : f32 to vector<128x128xf32>
    %41 = arith.select %38, %39, %40 : vector<128x128xi1>, vector<128x128xf32>
    %c6_i32 = arith.constant 6 : i32
    %42 = vector.broadcast %c6_i32 : i32 to vector<128x128xi32>
    %43 = arith.cmpi sle, %36, %42 : vector<128x128xi32>
    %c127_i32 = arith.constant 127 : i32
    %44 = tpu.dynamic_rotate %19 by %c127_i32 dim 0 : vector<128x128xf32>, i32 -> vector<128x128xf32>
    %cst_19 = arith.constant 0.000000e+00 : f32
    %45 = vector.broadcast %cst_19 : f32 to vector<128x128xf32>
    %46 = arith.select %43, %44, %45 : vector<128x128xi1>, vector<128x128xf32>
    %47 = tpu.concatenate %41, %19, %46 in 1 : vector<128x128xf32>, vector<128x128xf32>, vector<128x128xf32> -> vector<128x384xf32>
    %48 = arith.truncf %47 : vector<128x384xf32> to vector<128x384xbf16>
    %c0_20 = arith.constant 0 : index
    %c0_21 = arith.constant 0 : index
    %49 = vector.load %arg7[%c0_20, %c0_21] : memref<384x128xbf16, #tpu.memory_space<vmem>>, vector<384x128xbf16>
    %cst_22 = arith.constant dense<0.000000e+00> : vector<128x128xf32>
    %50 = tpu.matmul %48, %49, %cst_22 {dimension_numbers = #tpu.dot_dimension_numbers<[1], [0], [0], [1], [0, 0, 1, 1], [], []>} : vector<128x384xbf16>, vector<384x128xbf16>, vector<128x128xf32> -> vector<128x128xf32>
    %c0_23 = arith.constant 0 : index
    %c0_24 = arith.constant 0 : index
    %51 = vector.load %arg8[%c0_23, %c0_24] : memref<1x128xf32, #tpu.memory_space<vmem>>, vector<1x128xf32>
    %52 = vector.broadcast %51 : vector<1x128xf32> to vector<128x128xf32>
    %53 = arith.mulf %50, %52 : vector<128x128xf32>
    %c0_25 = arith.constant 0 : index
    %c0_26 = arith.constant 0 : index
    %54 = vector.load %arg9[%c0_25, %c0_26] : memref<1x128xf32, #tpu.memory_space<vmem>>, vector<1x128xf32>
    %55 = vector.broadcast %54 : vector<1x128xf32> to vector<128x128xf32>
    %56 = arith.addf %53, %55 : vector<128x128xf32>
    %cst_27 = arith.constant 0.000000e+00 : f32
    %57 = vector.broadcast %cst_27 : f32 to vector<128x128xf32>
    %58 = arith.maximumf %56, %57 : vector<128x128xf32>
    %59 = arith.truncf %58 : vector<128x128xf32> to vector<128x128xbf16>
    %60 = tpu.concatenate %59, %9 in 1 : vector<128x128xbf16>, vector<128x64xbf16> -> vector<128x192xbf16>
    %c0_28 = arith.constant 0 : index
    %c0_29 = arith.constant 0 : index
    %61 = vector.load %arg10[%c0_28, %c0_29] : memref<192x128xbf16, #tpu.memory_space<vmem>>, vector<192x128xbf16>
    %cst_30 = arith.constant dense<0.000000e+00> : vector<128x128xf32>
    %62 = tpu.matmul %60, %61, %cst_30 {dimension_numbers = #tpu.dot_dimension_numbers<[1], [0], [0], [1], [0, 0, 1, 1], [], []>} : vector<128x192xbf16>, vector<192x128xbf16>, vector<128x128xf32> -> vector<128x128xf32>
    %c0_31 = arith.constant 0 : index
    %c0_32 = arith.constant 0 : index
    %63 = vector.load %arg11[%c0_31, %c0_32] : memref<128x128xf32, #tpu.memory_space<vmem>>, vector<128x128xf32>
    tpu.vector_store %arg11[%c0_31, %c0_32], %62 {strides = array<i32>} : memref<128x128xf32, #tpu.memory_space<vmem>>, vector<128x128xf32>,
    return
  }
  func.func @transform_0(%arg0: i32) -> (i32, i32) {
    %c0_i32 = arith.constant 0 : i32
    %c0_i32_0 = arith.constant 0 : i32
    return %arg0, %c0_i32 : i32, i32
  }
  func.func @transform_1(%arg0: i32) -> (i32, i32) {
    %c0_i32 = arith.constant 0 : i32
    %c0_i32_0 = arith.constant 0 : i32
    %c0_i32_1 = arith.constant 0 : i32
    return %c0_i32, %c0_i32_0 : i32, i32
  }
  func.func @transform_2(%arg0: i32) -> (i32, i32) {
    %c0_i32 = arith.constant 0 : i32
    %c0_i32_0 = arith.constant 0 : i32
    %c0_i32_1 = arith.constant 0 : i32
    return %c0_i32, %c0_i32_0 : i32, i32
  }
  func.func @transform_3(%arg0: i32) -> (i32, i32) {
    %c0_i32 = arith.constant 0 : i32
    %c0_i32_0 = arith.constant 0 : i32
    %c0_i32_1 = arith.constant 0 : i32
    return %c0_i32, %c0_i32_0 : i32, i32
  }
  func.func @transform_4(%arg0: i32) -> (i32, i32) {
    %c0_i32 = arith.constant 0 : i32
    %c0_i32_0 = arith.constant 0 : i32
    %c0_i32_1 = arith.constant 0 : i32
    return %c0_i32, %c0_i32_0 : i32, i32
  }
  func.func @transform_5(%arg0: i32) -> (i32, i32) {
    %c0_i32 = arith.constant 0 : i32
    %c0_i32_0 = arith.constant 0 : i32
    %c0_i32_1 = arith.constant 0 : i32
    return %c0_i32, %c0_i32_0 : i32, i32
  }
  func.func @transform_6(%arg0: i32) -> (i32, i32) {
    %c0_i32 = arith.constant 0 : i32
    %c0_i32_0 = arith.constant 0 : i32
    %c0_i32_1 = arith.constant 0 : i32
    return %c0_i32, %c0_i32_0 : i32, i32
  }
  func.func @transform_7(%arg0: i32) -> (i32, i32) {
    %c0_i32 = arith.constant 0 : i32
    %c0_i32_0 = arith.constant 0 : i32
    %c0_i32_1 = arith.constant 0 : i32
    return %c0_i32, %c0_i32_0 : i32, i32
  }
  func.func @transform_8(%arg0: i32) -> (i32, i32) {
    %c0_i32 = arith.constant 0 : i32
    %c0_i32_0 = arith.constant 0 : i32
    %c0_i32_1 = arith.constant 0 : i32
    return %c0_i32, %c0_i32_0 : i32, i32
  }
  func.func @transform_9(%arg0: i32) -> (i32, i32) {
    %c0_i32 = arith.constant 0 : i32
    %c0_i32_0 = arith.constant 0 : i32
    %c0_i32_1 = arith.constant 0 : i32
    return %c0_i32, %c0_i32_0 : i32, i32
  }
  func.func @transform_10(%arg0: i32) -> (i32, i32) {
    %c0_i32 = arith.constant 0 : i32
    %c0_i32_0 = arith.constant 0 : i32
    return %arg0, %c0_i32 : i32, i32
  }
}

</mosaic_0001>

<bundles_post_ra>
// kernel: tpu_custom_call.1
= control target key start
LH: loop header
LB: loop body
LE: loop exit
PB: predicated region body
PF: predicated region fallthrough
CT: control target
= control target key end

     0   :  { %15 = vsyncpa [#allocation3], 0  ;;  %s3093_s0 = inlined_call_operand.vmem [shape: f32[256,64], index: 0, kind: input, shape index: {}]   ;;  %s3094_s1 = inlined_call_operand.vmem [shape: f32[1,64], index: 1, kind: input, shape index: {}]   ;;  %s3095_s2 = inlined_call_operand.vmem [shape: f32[1,64], index: 2, kind: input, shape index: {}]   ;;  %s3096_s3 = inlined_call_operand.vmem [shape: bf16[64,128], index: 3, kind: input, shape index: {}]   ;;  %s3097_s4 = inlined_call_operand.vmem [shape: f32[1,128], index: 4, kind: input, shape index: {}]   ;;  %s3098_s5 = inlined_call_operand.vmem [shape: f32[1,128], index: 5, kind: input, shape index: {}]   ;;  %s3099_s6 = inlined_call_operand.vmem [shape: bf16[384,128], index: 6, kind: input, shape index: {}]   ;;  %s3100_s7 = inlined_call_operand.vmem [shape: f32[1,128], index: 7, kind: input, shape index: {}]   ;;  %s3101_s8 = inlined_call_operand.vmem [shape: f32[1,128], index: 8, kind: input, shape index: {}]   ;;  %s3102_s9 = inlined_call_operand.vmem [shape: bf16[192,128], index: 9, kind: input, shape index: {}]   ;;  %s3103_s10 = inlined_call_operand.hbm [shape: f32[256,128], index: 10, kind: output, shape index: {}]  }
   0x1   :  { %17 = vsyncpa [#allocation3 + $0x1], 0  ;;  %s2242_s13 = smov 0   ;;  %s2244_s14 = smov 0  }
   0x2   :  { %s2246_s15 = smov 0   ;;  %s2248_s16 = smov 0  }
   0x3 LB: > { %s2263_s17 = sadd.s32 4294967295, %s2181_s16   ;;  %s1768_s18 = sadd.s32 4294967294, %s2181_s16   ;;  %s2181_s16 = sphi %s2248_s16, %s3145_s16   ;;  %s2177_s15 = sphi %s2246_s15, %s3144_s15   ;;  %s2173_s14 = sphi %s2244_s14, %s3143_s14   ;;  %s2169_s13 = sphi %s2242_s13, %s3142_s13  }
   0x4   : > { %s2267_s19 = sadd.s32 1, %s2181_s16   ;;  %s245_s20 = sadd.s32 1, %s2177_s15 }
   0x5   : > { %s242_s21 = ssub.s32 %s2181_s16, %s2267_s19  ;;  %p255_p0 = scmp.ne.s32.totalorder %s2177_s15, %s2173_s14 }
   0x6   : > { %p243_p1 = scmp.eq.s32.totalorder %s242_s21, 0  ;;  %p256_p2 = scmp.eq.s32.totalorder %s2263_s17, 1 }
   0x7   : > { %p261_p3 = scmp.ne.s32.totalorder %s2173_s14, %s2169_s13  ;;  %p262_p4 = scmp.eq.s32.totalorder %s1768_s18, 1 }
   0x8   : > { %s2278_s22 = scalar_select %p243_p1, %s2177_s15, %s245_s20  }
   0x9   : > { %p2280_p5 = por %p256_p2, %p255_p0  ;;  %p2284_p6 = por %p262_p4, %p261_p3 }
   0xa   : > { %3112 = sst [smem:[#allocation5_spill]] %s2278_s22  ;;  %p1771_p7 = scmp.ge.s32.totalorder %s2181_s16, 1 }
   0xb   : > { %p316_p8 = scmp.lt.s32.totalorder %s2181_s16, 3 }
   0xd   : > { %p317_p9 = pnand %p1771_p7, %p316_p8 }
   0xe   : > { %s1773_s27 = sshll.u32 (!%p317_p9), %s2263_s17, 4  ;;  %s351_s26 = sand.u32 (!%p317_p9), 1, %s2173_s14  }
   0xf   : > { %320 = sbr.rel (%p317_p9) target bundleno = 810 (0x32a), region = 60  ;;  %p355_p10 = scmp.lt.s32.totalorder (!%p317_p9), %s1773_s27, 31 }
  0x10   : > { %s1772_s28 = sshll.u32 (!%p317_p9), %s351_s26, 7  ;;  %s3053_s18 = scalar_lea.sflag (!%p317_p9), [#allocation3], %s351_s26 }
  0x11   : > { %s3024_s29 = scalar_lea.vmem (!%p317_p9), [#allocation2], %s1772_s28 }
  0x12   : > { %s1706_s22 = sshll.u32 (!%p317_p9), %s3024_s29, 4  ;;  %s3048_s22 = int_to_ptr.vmem [resolvable:$true] %s1706_s22 }
  0x14   : > { %v2081_v0 = vld [vmem:[%s3096_s3 + $0x18] sm:$0xff]   ;;  %v2082_v1 = vld [vmem:[%s3096_s3 + $0x10] sm:$0xff]   ;;  %s3147_s27 = smov (!%p355_p10, %s1773_s27), 31  ;;  %v2083_v2 = vld [vmem:[%s3096_s3 + $0x8] sm:$0xff]   ;;  %vm480_vm0 = vcmask 523264  }
  0x15   : > { %1983 = vmatprep.subr.bf16.mxu0 %v2081_v0  ;;  %v2303_v3 = vld [vmem:[%s3094_s1] ss:$0 sm:$0xff]  ;;  %s1774_s20 = sshll.u32 %s3147_s27, 3 }
  0x16   : > { %1984 = vmatpush3.bf16.msra.mxu0 %v2081_v0  ;;  %v2308_v4 = vld [vmem:[%s3095_s2] ss:$0 sm:$0xff]  ;;  %s2316_s30 = scalar_lea.vmem %s3093_s0, %s1774_s20  ;;  %s2184_s20 = smov [#allocation2]  }
  0x17   : > { %1985 = vmatprep.subr.bf16.mxu0 %v2082_v1  ;;  %v2084_v5 = vld [vmem:[%s3096_s3] sm:$0xff]   ;;  %v363_v7 = vld [vmem:[%s2316_s30 + $0x8] sm:$0xff]  ;;  %v364_v8 = vld [vmem:[%s2316_s30 + $0x10] sm:$0xff]  ;;  %s2125_s21 = sshll.u32 %s2184_s20, 4  ;;  %s2126_s21 = int_to_ptr.vmem [resolvable:$false] %s2125_s21 }
  0x18   : > { %v362_v6 = vld [vmem:[%s2316_s30] sm:$0xff]  ;;  %v386_v10 = vmul.f32 %v2303_v3, %v363_v7  ;;  %v365_v11 = vld [vmem:[%s2316_s30 + $0x18] sm:$0xff]  ;;  %v387_v12 = vmul.f32 %v2303_v3, %v364_v8  ;;  %v367_v14 = vld [vmem:[%s2316_s30 + $0x28] sm:$0xff]  ;;  %s2127_s25 = scalar_lea.vmem %s2126_s21, 4096  ;;  %p2128_p0 = scmp.lt.s32.totalorder %s3048_s22, %s2126_s21 }
  0x19   : > { %v385_v9 = vmul.f32 %v2303_v3, %v362_v6  ;;  %v366_v13 = vld [vmem:[%s2316_s30 + $0x20] sm:$0xff]  ;;  %v388_v15 = vmul.f32 %v2303_v3, %v365_v11  ;;  %v390_v17 = vmul.f32 %v2303_v3, %v367_v14  ;;  %v368_v18 = vld [vmem:[%s2316_s30 + $0x30] sm:$0xff]  ;;  %v369_v19 = vld [vmem:[%s2316_s30 + $0x38] sm:$0xff] }
  0x1a   : > { %1986 = vmatpush3.bf16.msra.mxu0 %v2082_v1  ;;  %v389_v16 = vmul.f32 %v2303_v3, %v366_v13  ;;  %v409_v21 = vadd.f32 %v2308_v4, %v386_v10  ;;  %v410_v22 = vadd.f32 %v2308_v4, %v387_v12  ;;  %v391_v23 = vmul.f32 %v2303_v3, %v368_v18  ;;  %v370_v24 = vld [vmem:[%s2316_s30 + $0x40] sm:$0xff]  ;;  %v371_v29 = vld [vmem:[%s2316_s30 + $0x48] sm:$0xff]  ;;  %v372_v30 = vld [vmem:[%s2316_s30 + $0x50] sm:$0xff] }
  0x1b   : > { %1987 = vmatprep.subr.bf16.mxu0 %v2083_v2  ;;  %v408_v20 = vadd.f32 %v2308_v4, %v385_v9  ;;  %v411_v25 = vadd.f32 %v2308_v4, %v388_v15  ;;  %v413_v27 = vadd.f32 %v2308_v4, %v390_v17  ;;  %v392_v28 = vmul.f32 %v2303_v3, %v369_v19  ;;  %v373_v31 = vld [vmem:[%s2316_s30 + $0x58] sm:$0xff]  ;;  %v374_v36 = vld [vmem:[%s2316_s30 + $0x60] sm:$0xff]  ;;  %v375_v40 = vld [vmem:[%s2316_s30 + $0x68] sm:$0xff] }
  0x1c   : > { %v412_v26 = vadd.f32 %v2308_v4, %v389_v16  ;;  %v425_v33 = vmax.f32 %v409_v21, 0.0  ;;  %v426_v34 = vmax.f32 %v410_v22, 0.0  ;;  %v414_v35 = vadd.f32 %v2308_v4, %v391_v23  ;;  %v376_v45 = vld [vmem:[%s2316_s30 + $0x70] sm:$0xff]  ;;  %v377_v50 = vld [vmem:[%s2316_s30 + $0x78] sm:$0xff]  ;;  %v2089_v18 = vld [vmem:[%s3099_s6 + $0x68] sm:$0xff]   ;;  %s1890_s30 = sshll.u32 %s2263_s17, 11 }
  0x1d   : > { %v424_v32 = vmax.f32 %v408_v20, 0.0  ;;  %v427_v37 = vmax.f32 %v411_v25, 0.0  ;;  %v429_v39 = vmax.f32 %v413_v27, 0.0  ;;  %v415_v42 = vadd.f32 %v2308_v4, %v392_v28  ;;  %v2085_v14 = vld [vmem:[%s3099_s6 + $0x78] sm:$0xff]   ;;  %v2087_v16 = vld [vmem:[%s3099_s6 + $0x70] sm:$0xff]   ;;  %v2090_v19 = vld [vmem:[%s3099_s6 + $0x28] sm:$0xff]   ;;  %s3046_s12 = scalar_lea.hbm %s3103_s10, %s1890_s30 }
  0x1e   : > { %1988 = vmatpush3.bf16.msra.mxu0 %v2083_v2  ;;  %v428_v38 = vmax.f32 %v412_v26, 0.0  ;;  %v393_v43 = vmul.f32 %v2303_v3, %v370_v24  ;;  %v394_v44 = vmul.f32 %v2303_v3, %v371_v29  ;;  %v430_v48 = vmax.f32 %v414_v35, 0.0  ;;  %v2086_v15 = vld [vmem:[%s3099_s6 + $0x38] sm:$0xff]   ;;  %1903 = vmatprep.subr.bf16.mxu1 %v2085_v14  ;;  %v2088_v17 = vld [vmem:[%s3099_s6 + $0x30] sm:$0xff]   ;;  %v2091_v20 = vld [vmem:[%s3099_s6 + $0x60] sm:$0xff]   ;;  %s2121_s17 = scalar_lea.vmem %s3048_s22, 2048 }
  0x1f   : > { %1989 = vmatprep.subr.bf16.mxu0 %v2084_v5  ;;  %v440_v41 = vpack.c.bf16 %v425_v33, %v424_v32  ;;  %v2351_v46 = vpack.c.bf16 %v427_v37, %v426_v34  ;;  %v395_v49 = vmul.f32 %v2303_v3, %v372_v30  ;;  %v396_v53 = vmul.f32 %v2303_v3, %v373_v31  ;;  %v2092_v21 = vld [vmem:[%s3099_s6 + $0x20] sm:$0xff]   ;;  %v2093_v22 = vld [vmem:[%s3099_s6 + $0x58] sm:$0xff]   ;;  %v2095_v24 = vld [vmem:[%s3099_s6 + $0x50] sm:$0xff]   ;;  %p2122_p11 = scmp.ne.s32.totalorder %s3048_s22, %s2121_s17  ;;  %p2129_p1 = scmp.lt.s32.totalorder %s2127_s25, %s2121_s17 }
  0x20   : > { %v2353_v47 = vpack.c.bf16 %v429_v39, %v428_v38  ;;  %v416_v51 = vadd.f32 %v2308_v4, %v393_v43  ;;  %v417_v52 = vadd.f32 %v2308_v4, %v394_v44  ;;  %v397_v54 = vmul.f32 %v2303_v3, %v374_v36  ;;  %1904 = vmatpush3.bf16.msra.mxu1 %v2086_v15  ;;  %v2094_v23 = vld [vmem:[%s3099_s6 + $0x18] sm:$0xff]   ;;  %v2096_v25 = vld [vmem:[%s3099_s6 + $0x10] sm:$0xff]   ;;  %v2097_v26 = vld [vmem:[%s3099_s6 + $0x48] sm:$0xff]  }
  0x21   : > { %1991 = vmatprep.mubr.msk.bf16.mxu0 %vm480_vm0, %v440_v41  ;;  %v418_v55 = vadd.f32 %v2308_v4, %v395_v49  ;;  %v398_v56 = vmul.f32 %v2303_v3, %v375_v40  ;;  %v399_v57 = vmul.f32 %v2303_v3, %v376_v45  ;;  %v431_v58 = vmax.f32 %v415_v42, 0.0  ;;  %1905 = vmatprep.subr.bf16.mxu1 %v2087_v16  ;;  %v2098_v27 = vld [vmem:[%s3099_s6 + $0x8] sm:$0xff]   ;;  %v2099_v28 = vld [vmem:[%s3099_s6 + $0x40] sm:$0xff]   ;;  %v2447_v30 = vld [vmem:[%s3099_s6 + $0xb8] sm:$0xff]   ;;  %p2123_p12 = pnand %p2122_p11, %p2280_p5  ;;  %p2130_p2 = por %p2129_p1, %p2128_p0 }
  0x22   : > { %1990 = vmatpush3.bf16.msra.mxu0 %v2084_v5  ;;  %v432_v59 = vmax.f32 %v416_v51, 0.0  ;;  %v419_v60 = vadd.f32 %v2308_v4, %v396_v53  ;;  %v420_v61 = vadd.f32 %v2308_v4, %v397_v54  ;;  %v433_v62 = vmax.f32 %v417_v52, 0.0  ;;  %v2100_v29 = vld [vmem:[%s3099_s6] sm:$0xff]  }
  0x23   : > { %v421_v63 = vadd.f32 %v2308_v4, %v398_v56  ;;  %v400_v0 = vmul.f32 %v2303_v3, %v377_v50  ;;  %v422_v1 = vadd.f32 %v2308_v4, %v399_v57  ;;  %v434_v2 = vmax.f32 %v418_v55, 0.0  ;;  %v2453_v33 = vld [vmem:[%s3097_s4] ss:$0 sm:$0xff]  ;;  %p2124_p13 = pneg %p2123_p12 }
  0x24   : > { %v435_v5 = vmax.f32 %v419_v60, 0.0  ;;  %v436_v6 = vmax.f32 %v420_v61, 0.0  ;;  %v2375_v9 = vpack.c.bf16 %v431_v58, %v430_v48  ;;  %v2377_v10 = vpack.c.bf16 %v433_v62, %v432_v59  ;;  %1906 = vmatpush3.bf16.msra.mxu1 %v2088_v17  ;;  %v2460_v38 = vld [vmem:[%s3098_s5] ss:$0 sm:$0xff] }
  0x25   : > { %1992 = vmatmul.mubr.msk.bf16.vlgmr.msra.gmra.mxu0 %vm480_vm0, %v2351_v46  ;;  %v437_v7 = vmax.f32 %v421_v63, 0.0  ;;  %v423_v8 = vadd.f32 %v2308_v4, %v400_v0  ;;  %v438_v11 = vmax.f32 %v422_v1, 0.0  ;;  %1907 = vmatprep.subr.bf16.mxu1 %v2089_v18  ;;  %v664_v42 = vlaneseq  ;;  %p2131_p3 = pnand %p2130_p2, %p2124_p13 }
  0x26   : > { %1995 = vmatprep.mubr.msk.bf16.mxu0 %vm480_vm0, %v2353_v47  ;;  %v2383_v3 = vpack.c.bf16 %v435_v5, %v434_v2 }
  0x27   : > { %v439_v12 = vmax.f32 %v423_v8, 0.0  ;;  %v2385_v13 = vpack.c.bf16 %v437_v7, %v436_v6  ;;  %v2474_v51 = vshrl.u32 %v664_v42, 7 }
  0x28   : > { %1908 = vmatpush3.bf16.msra.mxu1 %v2090_v19 }
  0x29   : > { %v2391_v4 = vpack.c.bf16 %v439_v12, %v438_v11  ;;  %1909 = vmatprep.subr.bf16.mxu1 %v2091_v20  ;;  %vm970_vm1 = vcmp.lt.s32.totalorder %v2474_v51, 7  ;;  %v2505_v5 = vadd.s32 8, %v2474_v51  ;;  %v685_v11 = vand.u32 7, %v2474_v51 }
  0x2a   : > { %v2512_v12 = vadd.s32 16, %v2474_v51  ;;  %vm905_vm3 = vcmp.lt.s32.totalorder %v2474_v51, 1 }
  0x2b   : > { %v692_v19 = vand.u32 7, %v2505_v5  ;;  %vm2526_vm2 = vcmp.ge.s32.totalorder %v685_v11, 1 }
  0x2c   : > { %1910 = vmatpush3.bf16.msra.mxu1 %v2092_v21  ;;  %v2521_v21 = vadd.s32 24, %v2474_v51  ;;  %v3131_v5 = vand.u32 7, %v2512_v12 }
  0x2d   : > { %1996 = vmatmul.mubr.msk.bf16.gmra.mxu0 %vm480_vm0, %v2375_v9  ;;  %1911 = vmatprep.subr.bf16.mxu1 %v2093_v22  ;;  %vm2545_vm4 = vcmp.ge.s32.totalorder %v692_v19, 1 }
  0x2e   : > { %1999 = vmatprep.mubr.msk.bf16.mxu0 %vm480_vm0, %v2377_v10  ;;  %vm1815_vm6 = vmpackc.low %vm2545_vm4, %vm2526_vm2 }
  0x30   : > { %1912 = vmatpush3.bf16.msra.mxu1 %v2094_v23 }
  0x31   : > { %1913 = vmatprep.subr.bf16.mxu1 %v2095_v24 }
  0x34   : > { %1914 = vmatpush3.bf16.msra.mxu1 %v2096_v25  ;;  %v3111_v25 = vand.u32 7, %v2512_v12 }
  0x35   : > { %2000 = vmatmul.mubr.msk.bf16.gmra.mxu0 %vm480_vm0, %v2383_v3  ;;  %1915 = vmatprep.subr.bf16.mxu1 %v2097_v26 }
  0x36   : > { %2003 = vmatprep.mubr.msk.bf16.mxu0 %vm480_vm0, %v2385_v13  ;;  %vm2560_vm5 = vcmp.ge.s32.totalorder %v3111_v25, 1 }
  0x38   : > { %1916 = vmatpush3.bf16.msra.mxu1 %v2098_v27 }
  0x39   : > { %1917 = vmatprep.subr.bf16.mxu1 %v2099_v28 }
  0x3c   : > { %1918 = vmatpush3.bf16.msra.mxu1 %v2100_v29 }
  0x3d   : > { %2004 = vmatmul.mubr.msk.bf16.gmra.mxu0 %vm480_vm0, %v2391_v4  ;;  %2007 = vmatprep.subr.bf16.mxu1 %v2447_v30 }
  0x3e   : > { %1877 = vmatprep.mubr.msk.bf16.mxu0 %vm480_vm0, %v440_v41 }
  0xe5   : > { %v1993_v31 = vpop.f32.mrf.mxu0 }
  0xe6   : > { %v611_v37 = vmul.f32 %v1993_v31, %v2453_v33 }
  0xe7   : > { %v539_v32 = vpop.f32.mrf.mxu0 }
  0xe8   : > { %v609_v34 = vmul.f32 %v2453_v33, %v539_v32  ;;  %v634_v45 = vadd.f32 %v2460_v38, %v611_v37 }
  0xe9   : > { %v1994_v35 = vpop.f32.mrf.mxu0 }
  0xea   : > { %v632_v39 = vadd.f32 %v2460_v38, %v609_v34  ;;  %v2479_v55 = vmax.f32 %v634_v45, 0.0  ;;  %v612_v0 = vmul.f32 %v1994_v35, %v2453_v33 }
  0xeb   : > { %v542_v36 = vpop.f32.mrf.mxu0 }
  0xec   : > { %v610_v40 = vmul.f32 %v2453_v33, %v542_v36  ;;  %v2468_v48 = vmax.f32 %v632_v39, 0.0  ;;  %v3105_v60 = vrot.slane %v2479_v55, 1  ;;  %v635_v14 = vadd.f32 %v2460_v38, %v612_v0 }
  0xed   : > { %v2464_v41 = vpop.f32.mrf.mxu0  ;;  %v891_v42 = vrot.slane %v2479_v55, 7 }
  0xee   : > { %v633_v43 = vadd.f32 %v2460_v38, %v610_v40  ;;  %v954_v56 = vrot.slane %v2468_v48, 1  ;;  %v2532_v26 = vmax.f32 %v635_v14, 0.0  ;;  %v889_v36 = vrot.slane %v2468_v48, 7 }
  0xef   : > { %v555_v44 = vpop.f32.mrf.mxu0  ;;  %v3110_v40 = vand.u32 7, %v2521_v21 }
  0xf0   : > { %v2470_v49 = vmax.f32 %v633_v43, 0.0  ;;  %v613_v43 = vmul.f32 %v2453_v33, %v555_v44  ;;  %v1007_v44 = vpack.c.bf16 %v2532_v26, %v2479_v55 }
  0xf1   : > { %v2472_v50 = vpop.f32.mrf.mxu0  ;;  %vm2639_vm7 = vcmp.ge.s32.totalorder %v3110_v40, 1 }
  0xf2   : > { %v955_v52 = vrot.slane %v2470_v49, 1  ;;  %v1004_v54 = vpack.c.bf16 %v2470_v49, %v2468_v48  ;;  %v890_v27 = vrot.slane %v2470_v49, 7  ;;  %v2650_v48 = vadd.s32 40, %v2474_v51  ;;  %vm1818_vm8 = vmpackc.low %vm2639_vm7, %vm2560_vm5 }
  0xf3   : > { %v558_v53 = vpop.f32.mrf.mxu0 }
  0xf4   : > { %1251 = vmatprep.mubr.bf16.mxu1 %v1004_v54  ;;  %v2491_v59 = vsel %vm970_vm1, %v954_v56, %v955_v52  ;;  %v2498_v62 = vsel %vm970_vm1, %v955_v52, %v3105_v60  ;;  %v614_v45 = vmul.f32 %v2453_v33, %v558_v53  ;;  %v920_v0 = vsel %vm905_vm3, %v889_v36, %v890_v27 }
  0xf5   : > { %v2482_v57 = vpop.f32.mrf.mxu0  ;;  %v1840_v6 = vpack.c.bf16 %v2498_v62, %v2491_v59 }
  0xf7   : > { %v2485_v58 = vpop.f32.mrf.mxu0 }
  0xf8   : > { %v617_v60 = vmul.f32 %v2453_v33, %v2485_v58 }
  0xf9   : > { %v2002_v61 = vpop.f32.mrf.mxu0 }
  0xfa   : > { %v620_v1 = vmul.f32 %v2002_v61, %v2453_v33 }
  0xfb   : > { %v2500_v63 = vpop.f32.mrf.mxu0 }
  0xfc   : > { %v643_v16 = vadd.f32 %v2460_v38, %v620_v1 }
  0xfd   : > { %v2005_v2 = vpop.f32.mrf.mxu0 }
  0xfe   : > { %v623_v7 = vmul.f32 %v2005_v2, %v2453_v33  ;;  %v2537_v31 = vmax.f32 %v643_v16, 0.0 }
  0xff   : > { %v587_v8 = vpop.f32.mrf.mxu0 }
 0x100   : > { %v646_v15 = vadd.f32 %v2460_v38, %v623_v7  ;;  %v621_v17 = vmul.f32 %v2453_v33, %v587_v8  ;;  %v900_v53 = vrot.slane %v2537_v31, 7 }
 0x101   : > { %v2006_v18 = vpop.f32.mrf.mxu0 }
 0x102   : > { %v624_v20 = vmul.f32 %v2006_v18, %v2453_v33  ;;  %v644_v22 = vadd.f32 %v2460_v38, %v621_v17  ;;  %v2539_v32 = vmax.f32 %v646_v15, 0.0  ;;  %v637_v17 = vadd.f32 %v2460_v38, %v614_v45 }
 0x103   : > { %v590_v23 = vpop.f32.mrf.mxu0 }
 0x104   : > { %v647_v28 = vadd.f32 %v2460_v38, %v624_v20  ;;  %v622_v29 = vmul.f32 %v2453_v33, %v590_v23  ;;  %v2541_v34 = vmax.f32 %v644_v22, 0.0  ;;  %v903_v1 = vrot.slane %v2539_v32, 7  ;;  %v2102_v22 = vld [vmem:[%s3099_s6 + $0xb0] sm:$0xff]  }
 0x105   : > { %v968_v2 = vrot.slane %v2539_v32, 1 }
 0x106   : > { %v2550_v37 = vmax.f32 %v647_v28, 0.0  ;;  %v645_v39 = vadd.f32 %v2460_v38, %v622_v29  ;;  %v901_v49 = vrot.slane %v2541_v34, 7  ;;  %v3104_v18 = vrot.slane %v2541_v34, 1 }
 0x108   : > { %v904_v54 = vrot.slane %v2550_v37, 7  ;;  %v2565_v61 = vmax.f32 %v645_v39, 0.0  ;;  %v969_v7 = vrot.slane %v2550_v37, 1  ;;  %v2594_v23 = vsel %vm905_vm3, %v900_v53, %v901_v49 }
 0x10a   : > { %v902_v8 = vrot.slane %v2565_v61, 7  ;;  %v967_v14 = vrot.slane %v2565_v61, 1  ;;  %v921_v15 = vsel %vm905_vm3, %v904_v54, %v889_v36  ;;  %v1022_v16 = vpack.c.bf16 %v2565_v61, %v2541_v34 }
 0x10b   : > { %v1816_v20 = vpack.c.bf16 %v920_v0, %v921_v15  ;;  %v2602_v28 = vsel %vm905_vm3, %v903_v1, %v904_v54  ;;  %v892_v54 = vrot.slane %v2532_v26, 7  ;;  %v636_v0 = vadd.f32 %v2460_v38, %v613_v43 }
 0x10c   : > { %v2598_v24 = vsel %vm905_vm3, %v901_v49, %v902_v8  ;;  %v2606_v29 = vsel %vm905_vm3, %v902_v8, %v903_v1  ;;  %v2610_v35 = vsel %vm970_vm1, %v967_v14, %v968_v2  ;;  %v2620_v45 = vsel %vm970_vm1, %v3104_v18, %v967_v14 }
 0x10d   : > { %1817 = vmatmul.mubr.msk.bf16.vlgmr.msra.gmra.mxu1 %vm1815_vm6, %v1816_v20  ;;  %v1834_v36 = vpack.c.bf16 %v2598_v24, %v2594_v23  ;;  %v1837_v39 = vpack.c.bf16 %v2602_v28, %v2606_v29  ;;  %v2624_v49 = vsel %vm970_vm1, %v968_v2, %v969_v7  ;;  %v2635_v8 = vsel %vm970_vm1, %v969_v7, %v954_v56 }
 0x10e   : > { %2008 = vmatpush3.bf16.msra.mxu1 %v2447_v30  ;;  %1259 = vmatprep.mubr.bf16.mxu1 %v1007_v44  ;;  %v2103_v30 = vld [vmem:[%s3099_s6 + $0xa8] sm:$0xff]   ;;  %v2647_v43 = vadd.s32 32, %v2474_v51  ;;  %v616_v44 = vmul.f32 %v2472_v50, %v2453_v33  ;;  %v2656_v7 = vmax.f32 %v637_v17, 0.0  ;;  %v919_v14 = vsel %vm905_vm3, %v890_v27, %v891_v42 }
 0x10f   : > { %2009 = vmatprep.subr.bf16.mxu1 %v2102_v22  ;;  %v615_v15 = vmul.f32 %v2464_v41, %v2453_v33  ;;  %v2662_v20 = vmax.f32 %v636_v0, 0.0  ;;  %v918_v1 = vsel %vm905_vm3, %v891_v42, %v892_v54  ;;  %v3106_v27 = vand.u32 7, %v2650_v48  ;;  %v2104_v41 = vld [vmem:[%s3099_s6 + $0xa0] sm:$0xff]  }
 0x110   : > { %v1819_v50 = vpack.c.bf16 %v918_v1, %v919_v14  ;;  %v3107_v17 = vand.u32 7, %v2647_v43  ;;  %v639_v0 = vadd.f32 %v2460_v38, %v616_v44  ;;  %v894_v42 = vrot.slane %v2656_v7, 7 }
 0x111   : > { %v1010_v52 = vpack.c.bf16 %v2656_v7, %v2662_v20  ;;  %v893_v1 = vrot.slane %v2662_v20, 7  ;;  %vm2689_vm10 = vcmp.ge.s32.totalorder %v3106_v27, 1  ;;  %v2694_v14 = vadd.s32 48, %v2474_v51 }
 0x112   : > { %2010 = vmatpush3.bf16.msra.mxu1 %v2102_v22  ;;  %v638_v22 = vadd.f32 %v2460_v38, %v615_v15  ;;  %vm2683_vm9 = vcmp.ge.s32.totalorder %v3107_v17, 1  ;;  %v2697_v15 = vadd.s32 56, %v2474_v51  ;;  %v2742_v44 = vadd.s32 64, %v2474_v51 }
 0x113   : > { %2011 = vmatprep.subr.bf16.mxu1 %v2103_v30  ;;  %v916_v56 = vsel %vm905_vm3, %v893_v1, %v894_v42  ;;  %v917_v27 = vsel %vm905_vm3, %v892_v54, %v893_v1  ;;  %vm1821_vm11 = vmpackc.low %vm2689_vm10, %vm2683_vm9  ;;  %v958_v61 = vrot.slane %v2662_v20, 1  ;;  %v3133_v23 = vand.u32 7, %v2647_v43 }
 0x114   : > { %v2708_v18 = vmax.f32 %v638_v22, 0.0  ;;  %v3108_v17 = vand.u32 7, %v2697_v15  ;;  %v2106_v22 = vld [vmem:[%s3099_s6 + $0x90] sm:$0xff]  }
 0x115   : > { %1820 = vmatmul.mubr.msk.bf16.gmra.mxu1 %vm1818_vm8, %v1819_v50  ;;  %v2702_v50 = vmax.f32 %v639_v0, 0.0  ;;  %v1822_v0 = vpack.c.bf16 %v916_v56, %v917_v27  ;;  %v640_v56 = vadd.f32 %v2460_v38, %v617_v60  ;;  %v2107_v60 = vld [vmem:[%s3099_s6 + $0x88] sm:$0xff]  }
 0x116   : > { %1267 = vmatprep.mubr.bf16.mxu1 %v1010_v52  ;;  %2012 = vmatpush3.bf16.msra.mxu1 %v2103_v30  ;;  %v2105_v30 = vld [vmem:[%s3099_s6 + $0x98] sm:$0xff]   ;;  %v618_v52 = vmul.f32 %v2453_v33, %v2500_v63  ;;  %v3109_v63 = vand.u32 7, %v2694_v14  ;;  %v895_v1 = vrot.slane %v2708_v18, 7  ;;  %vm2737_vm13 = vcmp.ge.s32.totalorder %v3108_v17, 1 }
 0x117   : > { %2013 = vmatprep.subr.bf16.mxu1 %v2104_v41  ;;  %v1013_v54 = vpack.c.bf16 %v2702_v50, %v2708_v18  ;;  %v2756_v17 = vmax.f32 %v640_v56, 0.0  ;;  %v2782_v56 = vadd.s32 88, %v2474_v51  ;;  %v961_v29 = vrot.slane %v2702_v50, 1 }
 0x118   : > { %v641_v58 = vadd.f32 %v2460_v38, %v618_v52  ;;  %vm2731_vm12 = vcmp.ge.s32.totalorder %v3109_v63, 1  ;;  %v2745_v52 = vadd.s32 72, %v2474_v51 }
 0x119   : > { %vm1824_vm14 = vmpackc.low %vm2737_vm13, %vm2731_vm12  ;;  %vm938_vm12 = vcmp.le.s32.totalorder %v685_v11, 6  ;;  %vm939_vm13 = vcmp.le.s32.totalorder %v692_v19, 6  ;;  %v960_v11 = vrot.slane %v2708_v18, 1  ;;  %v3132_v19 = vand.u32 7, %v2521_v21 }
 0x11a   : > { %2014 = vmatpush3.bf16.msra.mxu1 %v2104_v41  ;;  %v896_v41 = vrot.slane %v2702_v50, 7  ;;  %v748_v25 = vand.u32 7, %v2745_v52  ;;  %v962_v18 = vrot.slane %v2756_v17, 1  ;;  %v3139_v52 = vpack.c.bf16 %v2610_v35, %v2620_v45  ;;  %v2110_v35 = vld [vmem:[%s3102_s9 + $0x30] sm:$0xff]   ;;  %v2111_v45 = vld [vmem:[%s3102_s9 + $0x28] sm:$0xff]  }
 0x11b   : > { %2015 = vmatprep.subr.bf16.mxu1 %v2105_v30  ;;  %v979_v20 = vsel %vm970_vm1, %v960_v11, %v961_v29 }
 0x11c   : > { %v914_v63 = vsel %vm905_vm3, %v895_v1, %v896_v41  ;;  %vm882_vm2 = vcmp.ge.s32.totalorder %v748_v25, 1  ;;  %v978_v43 = vsel %vm970_vm1, %v961_v29, %v962_v18 }
 0x11d   : > { %1823 = vmatmul.mubr.msk.bf16.gmra.mxu1 %vm1821_vm11, %v1822_v0  ;;  %v915_v0 = vsel %vm905_vm3, %v894_v42, %v895_v1 }
 0x11e   : > { %1275 = vmatprep.mubr.bf16.mxu1 %v1013_v54  ;;  %2016 = vmatpush3.bf16.msra.mxu1 %v2105_v30  ;;  %v2750_v30 = vmax.f32 %v641_v58, 0.0  ;;  %v619_v54 = vmul.f32 %v2482_v57, %v2453_v33  ;;  %v1825_v40 = vpack.c.bf16 %v914_v63, %v915_v0  ;;  %v741_v58 = vand.u32 7, %v2742_v44  ;;  %v2108_v33 = vld [vmem:[%s3099_s6 + $0x80] sm:$0xff]  }
 0x11f   : > { %2017 = vmatprep.subr.bf16.mxu1 %v2106_v22  ;;  %v2779_v63 = vadd.s32 80, %v2474_v51  ;;  %v762_v0 = vand.u32 7, %v2782_v56  ;;  %v2116_v56 = vld [vmem:[%s3102_s9] sm:$0xff]  }
 0x120   : > { %v898_v57 = vrot.slane %v2750_v30, 7  ;;  %v1016_v42 = vpack.c.bf16 %v2750_v30, %v2756_v17  ;;  %v642_v1 = vadd.f32 %v2460_v38, %v619_v54  ;;  %vm881_vm15 = vcmp.ge.s32.totalorder %v741_v58, 1 }
 0x121   : > { %vm1827_vm4 = vmpackc.low %vm882_vm2, %vm881_vm15  ;;  %vm884_vm6 = vcmp.ge.s32.totalorder %v762_v0, 1  ;;  %vm940_vm2 = vcmp.le.s32.totalorder %v3131_v5, 6  ;;  %v963_v28 = vrot.slane %v2750_v30, 1  ;;  %v2183_v30 = vmov 0  }
 0x122   : > { %2018 = vmatpush3.bf16.msra.mxu1 %v2106_v22  ;;  %v897_v22 = vrot.slane %v2756_v17, 7  ;;  %vm1839_vm15 = vmpackc.low %vm939_vm13, %vm938_vm12  ;;  %v1849_v17 = vpack.c.bf16 %v978_v43, %v979_v20  ;;  %1579 = vmatprep.subr.bf16.mxu0 %v2183_v30 }
 0x123   : > { %2019 = vmatprep.subr.bf16.mxu1 %v2107_v60 }
 0x124   : > { %v912_v38 = vsel %vm905_vm3, %v897_v22, %v898_v57  ;;  %v913_v27 = vsel %vm905_vm3, %v896_v41, %v897_v22  ;;  %v2800_v41 = vadd.s32 96, %v2474_v51 }
 0x125   : > { %1826 = vmatmul.mubr.msk.bf16.gmra.mxu1 %vm1824_vm14, %v1825_v40  ;;  %v2786_v40 = vmax.f32 %v642_v1, 0.0  ;;  %v1828_v2 = vpack.c.bf16 %v912_v38, %v913_v27 }
 0x126   : > { %1283 = vmatprep.mubr.bf16.mxu1 %v1016_v42  ;;  %2020 = vmatpush3.bf16.msra.mxu1 %v2107_v60  ;;  %v755_v60 = vand.u32 7, %v2779_v63  ;;  %v769_v27 = vand.u32 7, %v2800_v41  ;;  %v2115_v63 = vld [vmem:[%s3102_s9 + $0x8] sm:$0xff]   ;;  %v2120_v41 = vld [vmem:[%s3102_s9 + $0x40] sm:$0xff]  }
 0x127   : > { %2021 = vmatprep.subr.bf16.mxu1 %v2108_v33  ;;  %v1019_v54 = vpack.c.bf16 %v2537_v31, %v2786_v40  ;;  %v899_v42 = vrot.slane %v2786_v40, 7 }
 0x128   : > { %vm883_vm5 = vcmp.ge.s32.totalorder %v755_v60, 1  ;;  %vm885_vm8 = vcmp.ge.s32.totalorder %v769_v27, 1 }
 0x129   : > { %v911_v1 = vsel %vm905_vm3, %v898_v57, %v899_v42  ;;  %v910_v22 = vsel %vm905_vm3, %v899_v42, %v900_v53  ;;  %vm1830_vm7 = vmpackc.low %vm884_vm6, %vm883_vm5  ;;  %v2819_v57 = vadd.s32 112, %v2474_v51  ;;  %v2822_v53 = vadd.s32 120, %v2474_v51 }
 0x12a   : > { %2022 = vmatpush3.bf16.msra.mxu1 %v2108_v33  ;;  %v2803_v33 = vadd.s32 104, %v2474_v51  ;;  %v1831_v38 = vpack.c.bf16 %v910_v22, %v911_v1  ;;  %vm942_vm5 = vcmp.le.s32.totalorder %v3133_v23, 6  ;;  %v2109_v51 = vld [vmem:[%s3102_s9 + $0x38] sm:$0xff]  }
 0x12b   : > { %v790_v42 = vand.u32 7, %v2822_v53  ;;  %1580 = vmatpush1.bf16.msra.mxu0 %v2109_v51 }
 0x12c   : > { %1581 = vmatprep.subr.bf16.mxu0 %v2183_v30 }
 0x12d   : > { %1829 = vmatmul.mubr.msk.bf16.gmra.mxu1 %vm1827_vm4, %v1828_v2  ;;  %v776_v2 = vand.u32 7, %v2803_v33  ;;  %v1025_v33 = vpack.c.bf16 %v2550_v37, %v2539_v32  ;;  %vm888_vm11 = vcmp.ge.s32.totalorder %v790_v42, 1  ;;  %v957_v32 = vrot.slane %v2532_v26, 1 }
 0x12e   : > { %1291 = vmatprep.mubr.bf16.mxu1 %v1019_v54  ;;  %v783_v54 = vand.u32 7, %v2819_v57  ;;  %vm941_vm4 = vcmp.le.s32.totalorder %v3132_v19, 6  ;;  %v3134_v26 = vand.u32 7, %v2650_v48 }
 0x12f   : > { %vm886_vm9 = vcmp.ge.s32.totalorder %v776_v2, 1  ;;  %v982_v37 = vsel %vm970_vm1, %v957_v32, %v958_v61  ;;  %1582 = vmatpush1.bf16.msra.mxu0 %v2110_v35 }
 0x130   : > { %vm1833_vm3 = vmpackc.low %vm886_vm9, %vm885_vm8  ;;  %vm887_vm10 = vcmp.ge.s32.totalorder %v783_v54, 1  ;;  %vm943_vm6 = vcmp.le.s32.totalorder %v3134_v26, 6  ;;  %1583 = vmatprep.subr.bf16.mxu0 %v2183_v30 }
 0x131   : > { %vm1836_vm14 = vmpackc.low %vm888_vm11, %vm887_vm10  ;;  %vm946_vm10 = vcmp.le.s32.totalorder %v741_v58, 6  ;;  %vm947_vm11 = vcmp.le.s32.totalorder %v748_v25, 6  ;;  %v3138_v25 = vrot.slane %v2541_v34, 1  ;;  %v3140_v34 = vpack.c.bf16 %v2635_v8, %v2624_v49  ;;  %v2112_v49 = vld [vmem:[%s3102_s9 + $0x20] sm:$0xff]   ;;  %v2113_v8 = vld [vmem:[%s3102_s9 + $0x18] sm:$0xff]  }
 0x132   : > { %vm1845_vm8 = vmpackc.low %vm943_vm6, %vm942_vm5  ;;  %v2114_v58 = vld [vmem:[%s3102_s9 + $0x10] sm:$0xff]  }
 0x133   : > { %vm1851_vm13 = vmpackc.low %vm947_vm11, %vm946_vm10  ;;  %1584 = vmatpush1.bf16.msra.mxu0 %v2111_v45 }
 0x134   : > { %1585 = vmatprep.subr.bf16.mxu0 %v2183_v30 }
 0x135   : > { %1832 = vmatmul.mubr.msk.bf16.gmra.mxu1 %vm1830_vm7, %v1831_v38  ;;  %vm1842_vm7 = vmpackc.low %vm941_vm4, %vm940_vm2  ;;  %vm950_vm2 = vcmp.le.s32.totalorder %v769_v27, 6  ;;  %vm951_vm4 = vcmp.le.s32.totalorder %v776_v2, 6 }
 0x136   : > { %1299 = vmatprep.mubr.bf16.mxu1 %v1022_v16  ;;  %v959_v16 = vrot.slane %v2656_v7, 1  ;;  %v977_v7 = vsel %vm970_vm1, %v962_v18, %v963_v28  ;;  %vm1857_vm6 = vmpackc.low %vm951_vm4, %vm950_vm2 }
 0x137   : > { %1586 = vmatpush1.bf16.msra.mxu0 %v2112_v49 }
 0x138   : > { %v980_v59 = vsel %vm970_vm1, %v959_v16, %v960_v11  ;;  %v981_v62 = vsel %vm970_vm1, %v958_v61, %v959_v16  ;;  %1587 = vmatprep.subr.bf16.mxu0 %v2183_v30 }
 0x139   : > { %v1846_v24 = vpack.c.bf16 %v980_v59, %v981_v62 }
 0x13b   : > { %1588 = vmatpush1.bf16.msra.mxu0 %v2113_v8  ;;  %v2965_v8 = vld [vmem:[%s3101_s8] ss:$0 sm:$0xff] }
 0x13c   : > { %1589 = vmatprep.subr.bf16.mxu0 %v2183_v30 }
 0x13d   : > { %1835 = vmatmul.mubr.msk.bf16.gmra.mxu1 %vm1833_vm3, %v1834_v36  ;;  %v964_v36 = vrot.slane %v2786_v40, 1  ;;  %v2117_v40 = vld [vmem:[%s3102_s9 + $0x58] sm:$0xff]  }
 0x13e   : > { %1307 = vmatprep.mubr.bf16.mxu1 %v1025_v33 }
 0x13f   : > { %v976_v48 = vsel %vm970_vm1, %v963_v28, %v964_v36  ;;  %1590 = vmatpush1.bf16.msra.mxu0 %v2114_v58 }
 0x140   : > { %1591 = vmatprep.subr.bf16.mxu0 %v2183_v30 }
 0x143   : > { %1592 = vmatpush1.bf16.msra.mxu0 %v2115_v63 }
 0x144   : > { %1593 = vmatprep.subr.bf16.mxu0 %v2183_v30 }
 0x145   : > { %1838 = vmatmul.mubr.msk.bf16.gmra.mxu1 %vm1836_vm14, %v1837_v39  ;;  %v3136_v39 = vand.u32 7, %v2694_v14  ;;  %v1852_v14 = vpack.c.bf16 %v976_v48, %v977_v7  ;;  %vm948_vm14 = vcmp.le.s32.totalorder %v755_v60, 6  ;;  %v2118_v60 = vld [vmem:[%s3102_s9 + $0x50] sm:$0xff]  }
 0x146   : > { %2023 = vmatprep.mubr.msk.bf16.mxu1 %vm1839_vm15, %v1840_v6  ;;  %v3135_v6 = vrot.slane %v2479_v55, 1  ;;  %v3137_v55 = vand.u32 7, %v2697_v15  ;;  %v965_v15 = vrot.slane %v2537_v31, 1  ;;  %vm949_vm15 = vcmp.le.s32.totalorder %v762_v0, 6  ;;  %v2119_v0 = vld [vmem:[%s3102_s9 + $0x48] sm:$0xff]  }
 0x147   : > { %vm944_vm9 = vcmp.le.s32.totalorder %v3136_v39, 6  ;;  %vm1854_vm5 = vmpackc.low %vm949_vm15, %vm948_vm14  ;;  %1594 = vmatpush1.bf16.msra.mxu0 %v2116_v56 }
 0x148   : > { %v983_v12 = vsel %vm970_vm1, %v3135_v6, %v957_v32  ;;  %vm945_vm3 = vcmp.le.s32.totalorder %v3137_v55, 6  ;;  %v974_v50 = vsel %vm970_vm1, %v965_v15, %v3138_v25  ;;  %v975_v44 = vsel %vm970_vm1, %v964_v36, %v965_v15  ;;  %1603 = vmatprep.subr.bf16.mxu0 %v2183_v30 }
 0x149   : > { %v1843_v21 = vpack.c.bf16 %v982_v37, %v983_v12  ;;  %vm1848_vm12 = vmpackc.low %vm945_vm3, %vm944_vm9  ;;  %v1855_v31 = vpack.c.bf16 %v974_v50, %v975_v44 }
 0x14b   : > { %1604 = vmatpush2.bf16.msra.mxu0 %v2117_v40 }
 0x14c   : > { %1605 = vmatprep.subr.bf16.mxu0 %v2183_v30 }
 0x14d   : > { %2024 = vmatmul.mubr.msk.bf16.vlgmr.msra.gmra.mxu1 %vm1842_vm7, %v1843_v21  ;;  %vm952_vm7 = vcmp.le.s32.totalorder %v783_v54, 6 }
 0x14e   : > { %2027 = vmatprep.mubr.msk.bf16.mxu1 %vm1845_vm8, %v1846_v24  ;;  %vm953_vm8 = vcmp.le.s32.totalorder %v790_v42, 6 }
 0x14f   : > { %vm1860_vm9 = vmpackc.low %vm953_vm8, %vm952_vm7  ;;  %1606 = vmatpush2.bf16.msra.mxu0 %v2118_v60 }
 0x150   : > { %1607 = vmatprep.subr.bf16.mxu0 %v2183_v30 }
 0x153   : > { %1608 = vmatpush2.bf16.msra.mxu0 %v2119_v0 }
 0x154   : > { %1609 = vmatprep.subr.bf16.mxu0 %v2183_v30 }
 0x155   : > { %2028 = vmatmul.mubr.msk.bf16.gmra.mxu1 %vm1848_vm12, %v1849_v17 }
 0x156   : > { %2031 = vmatprep.mubr.msk.bf16.mxu1 %vm1851_vm13, %v1852_v14 }
 0x157   : > { %1610 = vmatpush2.bf16.msra.mxu0 %v2120_v41 }
 0x15d   : > { %2032 = vmatmul.mubr.msk.bf16.gmra.mxu1 %vm1854_vm5, %v1855_v31 }
 0x15e   : > { %2035 = vmatprep.mubr.msk.bf16.mxu1 %vm1857_vm6, %v3139_v52  ;;  %v2959_v52 = vld [vmem:[%s3100_s7] ss:$0 sm:$0xff] }
 0x165   : > { %2036 = vmatmul.mubr.msk.bf16.gmra.mxu1 %vm1860_vm9, %v3140_v34 }
 0x1cd   : > { %v1919_v1 = vpop.f32.mrf.mxu1 }
 0x1cf   : > { %v1920_v22 = vpop.f32.mrf.mxu1 }
 0x1d0   : > { %v1921_v38 = vadd.f32 %v1920_v22, %v1919_v1 }
 0x1d1   : > { %v1922_v27 = vpop.f32.mrf.mxu1 }
 0x1d3   : > { %v1923_v2 = vpop.f32.mrf.mxu1 }
 0x1d4   : > { %v1924_v49 = vadd.f32 %v1923_v2, %v1922_v27 }
 0x1d5   : > { %v1925_v57 = vpop.f32.mrf.mxu1 }
 0x1d7   : > { %v1926_v53 = vpop.f32.mrf.mxu1 }
 0x1d8   : > { %v1927_v54 = vadd.f32 %v1926_v53, %v1925_v57 }
 0x1d9   : > { %v1928_v42 = vpop.f32.mrf.mxu1 }
 0x1db   : > { %v1929_v33 = vpop.f32.mrf.mxu1 }
 0x1dc   : > { %v1930_v30 = vadd.f32 %v1929_v33, %v1928_v42 }
 0x1dd   : > { %v1931_v61 = vpop.f32.mrf.mxu1 }
 0x1df   : > { %v1932_v16 = vpop.f32.mrf.mxu1 }
 0x1e0   : > { %v1933_v32 = vadd.f32 %v1932_v16, %v1931_v61 }
 0x1e1   : > { %v1934_v11 = vpop.f32.mrf.mxu1 }
 0x1e3   : > { %v1935_v5 = vpop.f32.mrf.mxu1 }
 0x1e5   : > { %v1937_v19 = vpop.f32.mrf.mxu1 }
 0x1e7   : > { %v1938_v37 = vpop.f32.mrf.mxu1 }
 0x1e8   : > { %v1939_v23 = vadd.f32 %v1938_v37, %v1937_v19 }
 0x1e9   : > { %v1940_v26 = vpop.f32.mrf.mxu1 }
 0x1eb   : > { %v1941_v59 = vpop.f32.mrf.mxu1 }
 0x1ec   : > { %v1942_v2 = vadd.f32 %v1941_v59, %v1940_v26 }
 0x1ed   : > { %v1943_v62 = vpop.f32.mrf.mxu1 }
 0x1ef   : > { %v1944_v6 = vpop.f32.mrf.mxu1 }
 0x1f0   : > { %v2938_v12 = vadd.f32 %v1944_v6, %v1943_v62  ;;  %v1936_v6 = vadd.f32 %v1935_v5, %v1934_v11 }
 0x1f1   : > { %v2940_v21 = vpop.f32.mrf.mxu1 }
 0x1f3   : > { %v2942_v18 = vpop.f32.mrf.mxu1 }
 0x1f5   : > { %v1949_v24 = vpop.f32.mrf.mxu1 }
 0x1f7   : > { %v1950_v28 = vpop.f32.mrf.mxu1 }
 0x1f8   : > { %v1951_v29 = vadd.f32 %v1950_v28, %v1949_v24 }
 0x1f9   : > { %v1952_v36 = vpop.f32.mrf.mxu1 }
 0x1fb   : > { %v1953_v39 = vpop.f32.mrf.mxu1 }
 0x1fc   : > { %v1954_v5 = vadd.f32 %v1953_v39, %v1952_v36 }
 0x1fd   : > { %v1955_v55 = vpop.f32.mrf.mxu1 }
 0x1ff   : > { %v1956_v43 = vpop.f32.mrf.mxu1 }
 0x200   : > { %v2944_v48 = vadd.f32 %v1956_v43, %v1955_v55 }
 0x201   : > { %v2946_v7 = vpop.f32.mrf.mxu1 }
 0x203   : > { %v2948_v20 = vpop.f32.mrf.mxu1 }
 0x205   : > { %v1961_v17 = vpop.f32.mrf.mxu1 }
 0x207   : > { %v1962_v14 = vpop.f32.mrf.mxu1 }
 0x208   : > { %v2950_v15 = vadd.f32 %v1962_v14, %v1961_v17 }
 0x209   : > { %v2952_v25 = vpop.f32.mrf.mxu1 }
 0x20b   : > { %v2954_v50 = vpop.f32.mrf.mxu1 }
 0x20d   : > { %v2025_v44 = vpop.f32.mrf.mxu1 }
 0x20e   : > { %v1359_v31 = vadd.f32 %v2025_v44, %v1927_v54 }
 0x20f   : > { %v1350_v34 = vpop.f32.mrf.mxu1 }
 0x210   : > { %v1351_v51 = vadd.f32 %v1921_v38, %v1350_v34  ;;  %v1422_v35 = vmul.f32 %v2959_v52, %v1359_v31 }
 0x211   : > { %v2026_v45 = vpop.f32.mrf.mxu1 }
 0x212   : > { %v1420_v58 = vmul.f32 %v2959_v52, %v1351_v51  ;;  %v1362_v63 = vadd.f32 %v2026_v45, %v1930_v30  ;;  %v1445_v0 = vadd.f32 %v2965_v8, %v1422_v35 }
 0x213   : > { %v1353_v56 = vpop.f32.mrf.mxu1 }
 0x214   : > { %v1423_v40 = vmul.f32 %v2959_v52, %v1362_v63  ;;  %v1354_v60 = vadd.f32 %v1924_v49, %v1353_v56  ;;  %v1443_v1 = vadd.f32 %v2965_v8, %v1420_v58  ;;  %v1461_v61 = vmax.f32 %v1445_v0, 0.0 }
 0x215   : > { %v2029_v41 = vpop.f32.mrf.mxu1 }
 0x216   : > { %v1446_v22 = vadd.f32 %v2965_v8, %v1423_v40  ;;  %v1421_v38 = vmul.f32 %v2959_v52, %v1354_v60  ;;  %v1375_v27 = vadd.f32 %v2029_v41, %v1939_v23  ;;  %v1459_v19 = vmax.f32 %v1443_v1, 0.0 }
 0x217   : > { %v1366_v57 = vpop.f32.mrf.mxu1 }
 0x218   : > { %v1462_v53 = vmax.f32 %v1446_v22, 0.0  ;;  %v1444_v54 = vadd.f32 %v2965_v8, %v1421_v38  ;;  %v1426_v42 = vmul.f32 %v2959_v52, %v1375_v27  ;;  %v1367_v33 = vadd.f32 %v1933_v32, %v1366_v57 }
 0x219   : > { %v2030_v16 = vpop.f32.mrf.mxu1 }
 0x21a   : > { %v1460_v37 = vmax.f32 %v1444_v54, 0.0  ;;  %v1378_v62 = vadd.f32 %v2030_v16, %v1942_v2  ;;  %v1424_v24 = vmul.f32 %v2959_v52, %v1367_v33  ;;  %v1476_v55 = vpack.c.bf16 %v1462_v53, %v1461_v61 }
 0x21b   : > { %v1369_v28 = vpop.f32.mrf.mxu1  ;;  %v1449_v23 = vadd.f32 %v2965_v8, %v1426_v42 }
 0x21c   : > { %v1475_v43 = vpack.c.bf16 %v1460_v37, %v1459_v19  ;;  %v1427_v26 = vmul.f32 %v2959_v52, %v1378_v62  ;;  %v1370_v59 = vadd.f32 %v1936_v6, %v1369_v28  ;;  %v1447_v44 = vadd.f32 %v2965_v8, %v1424_v24 }
 0x21d   : > { %v2033_v17 = vpop.f32.mrf.mxu1  ;;  %v1465_v34 = vmax.f32 %v1449_v23, 0.0 }
 0x21e   : > { %v1450_v14 = vadd.f32 %v2965_v8, %v1427_v26  ;;  %v1391_v32 = vadd.f32 %v2033_v17, %v1951_v29  ;;  %1612 = vmatmul.mubr.bf16.vlgmr.msra.gmra.mxu0 %v1475_v43  ;;  %v1425_v31 = vmul.f32 %v2959_v52, %v1370_v59  ;;  %v1948_v29 = vadd.f32 %v2942_v18, %v2940_v21 }
 0x21f   : > { %v1382_v11 = vpop.f32.mrf.mxu1  ;;  %1878 = vmatprep.mubr.msk.bf16.mxu0 %vm480_vm0, %v2351_v46  ;;  %v1463_v56 = vmax.f32 %v1447_v44, 0.0  ;;  %v1966_v18 = vadd.f32 %v2954_v50, %v2952_v25 }
 0x220   : > { %v1466_v30 = vmax.f32 %v1450_v14, 0.0  ;;  %v1383_v51 = vadd.f32 %v2938_v12, %v1382_v11  ;;  %v1448_v35 = vadd.f32 %v2965_v8, %v1425_v31  ;;  %v1430_v45 = vmul.f32 %v2959_v52, %v1391_v32 }
 0x221   : > { %v2034_v49 = vpop.f32.mrf.mxu1 }
 0x222   : > { %v1394_v58 = vadd.f32 %v2034_v49, %v1954_v5  ;;  %v1478_v63 = vpack.c.bf16 %v1466_v30, %v1465_v34  ;;  %v1464_v40 = vmax.f32 %v1448_v35, 0.0  ;;  %v1428_v60 = vmul.f32 %v2959_v52, %v1383_v51 }
 0x223   : > { %v1385_v46 = vpop.f32.mrf.mxu1  ;;  %v1453_v12 = vadd.f32 %v2965_v8, %v1430_v45 }
 0x224   : > { %v1431_v36 = vmul.f32 %v2959_v52, %v1394_v58  ;;  %v1386_v39 = vadd.f32 %v1948_v29, %v1385_v46  ;;  %v1477_v41 = vpack.c.bf16 %v1464_v40, %v1463_v56  ;;  %v1451_v38 = vadd.f32 %v2965_v8, %v1428_v60 }
 0x225   : > { %v2037_v0 = vpop.f32.mrf.mxu1  ;;  %v1469_v42 = vmax.f32 %v1453_v12, 0.0 }
 0x226   : > { %v1454_v1 = vadd.f32 %v2965_v8, %v1431_v36  ;;  %v1429_v22 = vmul.f32 %v2959_v52, %v1386_v39  ;;  %v1407_v21 = vadd.f32 %v2037_v0, %v2950_v15  ;;  %1620 = vmatmul.mubr.bf16.gmra.mxu0 %v1476_v55  ;;  %v1960_v15 = vadd.f32 %v2948_v20, %v2946_v7 }
 0x227   : > { %v1398_v27 = vpop.f32.mrf.mxu1  ;;  %1879 = vmatprep.mubr.msk.bf16.mxu0 %vm480_vm0, %v2353_v47  ;;  %v1467_v16 = vmax.f32 %v1451_v38, 0.0 }
 0x228   : > { %v1470_v2 = vmax.f32 %v1454_v1, 0.0  ;;  %v1452_v57 = vadd.f32 %v2965_v8, %v1429_v22  ;;  %v1434_v53 = vmul.f32 %v2959_v52, %v1407_v21  ;;  %v1399_v54 = vadd.f32 %v2944_v48, %v1398_v27 }
 0x229   : > { %v2038_v33 = vpop.f32.mrf.mxu1 }
 0x22a   : > { %v1468_v61 = vmax.f32 %v1452_v57, 0.0  ;;  %v1432_v25 = vmul.f32 %v2959_v52, %v1399_v54  ;;  %v1410_v50 = vadd.f32 %v2038_v33, %v1966_v18  ;;  %v1480_v37 = vpack.c.bf16 %v1470_v2, %v1469_v42 }
 0x22b   : > { %v1401_v19 = vpop.f32.mrf.mxu1  ;;  %v1457_v47 = vadd.f32 %v2965_v8, %v1434_v53 }
 0x22c   : > { %v1435_v62 = vmul.f32 %v2959_v52, %v1410_v50  ;;  %v1402_v6 = vadd.f32 %v1960_v15, %v1401_v19  ;;  %v1479_v24 = vpack.c.bf16 %v1468_v61, %v1467_v16  ;;  %v1455_v48 = vadd.f32 %v2965_v8, %v1432_v25 }
 0x22d   : > { %v1473_v7 = vmax.f32 %v1457_v47, 0.0 }
 0x22e   : > { %v1458_v28 = vadd.f32 %v2965_v8, %v1435_v62  ;;  %v1433_v55 = vmul.f32 %v2959_v52, %v1402_v6  ;;  %1628 = vmatmul.mubr.bf16.gmra.mxu0 %v1477_v41  ;;  %v1471_v23 = vmax.f32 %v1455_v48, 0.0 }
 0x22f   : > { %1880 = vmatprep.mubr.msk.bf16.mxu0 %vm480_vm0, %v2375_v9 }
 0x230   : > { %v1474_v20 = vmax.f32 %v1458_v28, 0.0  ;;  %v1456_v43 = vadd.f32 %v2965_v8, %v1433_v55 }
 0x232   : > { %v1472_v26 = vmax.f32 %v1456_v43, 0.0  ;;  %v1482_v59 = vpack.c.bf16 %v1474_v20, %v1473_v7 }
 0x234   : > { %v1481_v17 = vpack.c.bf16 %v1472_v26, %v1471_v23 }
 0x236   : > { %1636 = vmatmul.mubr.bf16.gmra.mxu0 %v1478_v63 }
 0x237   : > { %1881 = vmatprep.mubr.msk.bf16.mxu0 %vm480_vm0, %v2377_v10 }
 0x23e   : > { %1644 = vmatmul.mubr.bf16.gmra.mxu0 %v1479_v24 }
 0x23f   : > { %1882 = vmatprep.mubr.msk.bf16.mxu0 %vm480_vm0, %v2383_v3 }
 0x246   : > { %1652 = vmatmul.mubr.bf16.gmra.mxu0 %v1480_v37 }
 0x247   : > { %1883 = vmatprep.mubr.msk.bf16.mxu0 %vm480_vm0, %v2385_v13 }
 0x24e   : > { %1660 = vmatmul.mubr.bf16.gmra.mxu0 %v1481_v17 }
 0x24f   : > { %1884 = vmatprep.mubr.msk.bf16.mxu0 %vm480_vm0, %v2391_v4 }
 0x256   : > { %1668 = vmatmul.mubr.bf16.gmra.mxu0 %v1482_v59 }
 0x2de   : > { %v1613_v9 = vpop.f32.mrf.mxu0 }
 0x2df   : > { %1676 = vst [vmem:[%s3024_s29] sm:$0xff] %v1613_v9 }
 0x2e0   : > { %v1615_v10 = vpop.f32.mrf.mxu0 }
 0x2e2   : > { %v1616_v3 = vpop.f32.mrf.mxu0 }
 0x2e3   : > { %1677 = vst [vmem:[%s3024_s29 + $0x8] sm:$0xff] %v1616_v3 }
 0x2e4   : > { %v1618_v13 = vpop.f32.mrf.mxu0 }
 0x2e6   : > { %v1621_v4 = vpop.f32.mrf.mxu0 }
 0x2e7   : > { %1678 = vst [vmem:[%s3024_s29 + $0x10] sm:$0xff] %v1621_v4 }
 0x2e8   : > { %v1623_v52 = vpop.f32.mrf.mxu0 }
 0x2ea   : > { %v1624_v8 = vpop.f32.mrf.mxu0 }
 0x2eb   : > { %1679 = vst [vmem:[%s3024_s29 + $0x18] sm:$0xff] %v1624_v8 }
 0x2ec   : > { %v1626_v14 = vpop.f32.mrf.mxu0 }
 0x2ee   : > { %v1629_v32 = vpop.f32.mrf.mxu0 }
 0x2ef   : > { %1680 = vst [vmem:[%s3024_s29 + $0x20] sm:$0xff] %v1629_v32 }
 0x2f0   : > { %v1631_v44 = vpop.f32.mrf.mxu0 }
 0x2f2   : > { %v1632_v31 = vpop.f32.mrf.mxu0 }
 0x2f3   : > { %1681 = vst [vmem:[%s3024_s29 + $0x28] sm:$0xff] %v1632_v31 }
 0x2f4   : > { %v1634_v11 = vpop.f32.mrf.mxu0 }
 0x2f6   : > { %v1637_v5 = vpop.f32.mrf.mxu0 }
 0x2f7   : > { %1682 = vst [vmem:[%s3024_s29 + $0x30] sm:$0xff] %v1637_v5 }
 0x2f8   : > { %v1639_v34 = vpop.f32.mrf.mxu0 }
 0x2fa   : > { %v1640_v30 = vpop.f32.mrf.mxu0 }
 0x2fb   : > { %1683 = vst [vmem:[%s3024_s29 + $0x38] sm:$0xff] %v1640_v30 }
 0x2fc   : > { %v1642_v51 = vpop.f32.mrf.mxu0 }
 0x2fe   : > { %v1645_v35 = vpop.f32.mrf.mxu0 }
 0x2ff   : > { %1684 = vst [vmem:[%s3024_s29 + $0x40] sm:$0xff] %v1645_v35 }
 0x300   : > { %v1647_v45 = vpop.f32.mrf.mxu0 }
 0x302   : > { %v1648_v49 = vpop.f32.mrf.mxu0 }
 0x303   : > { %1685 = vst [vmem:[%s3024_s29 + $0x48] sm:$0xff] %v1648_v49 }
 0x304   : > { %v1650_v29 = vpop.f32.mrf.mxu0 }
 0x306   : > { %v1653_v58 = vpop.f32.mrf.mxu0 }
 0x307   : > { %1686 = vst [vmem:[%s3024_s29 + $0x50] sm:$0xff] %v1653_v58 }
 0x308   : > { %v1655_v63 = vpop.f32.mrf.mxu0 }
 0x30a   : > { %v1656_v56 = vpop.f32.mrf.mxu0 }
 0x30b   : > { %1687 = vst [vmem:[%s3024_s29 + $0x58] sm:$0xff] %v1656_v56 }
 0x30c   : > { %v1658_v40 = vpop.f32.mrf.mxu0 }
 0x30e   : > { %v1661_v60 = vpop.f32.mrf.mxu0 }
 0x30f   : > { %1688 = vst [vmem:[%s3024_s29 + $0x60] sm:$0xff] %v1661_v60 }
 0x310   : > { %v1663_v46 = vpop.f32.mrf.mxu0 }
 0x312   : > { %v1664_v36 = vpop.f32.mrf.mxu0 }
 0x313   : > { %1689 = vst [vmem:[%s3024_s29 + $0x68] sm:$0xff] %v1664_v36 }
 0x314   : > { %v1666_v39 = vpop.f32.mrf.mxu0 }
 0x316   : > { %v1669_v12 = vpop.f32.mrf.mxu0 }
 0x317   : > { %1690 = vst [vmem:[%s3024_s29 + $0x70] sm:$0xff] %v1669_v12 }
 0x318   : > { %v1671_v0 = vpop.f32.mrf.mxu0 }
 0x31a   : > { %v1672_v41 = vpop.f32.mrf.mxu0 }
 0x31b   : > { %1691 = vst [vmem:[%s3024_s29 + $0x78] sm:$0xff] %v1672_v41 }
 0x31c   : > { %v1674_v1 = vpop.f32.mrf.mxu0 }
 0x31d   : > { %2134 = shalt.err (!%p2131_p3)
}
 0x31e   : > { %s2135_s26 = scalar_lea.hbm %s3046_s12, 2048  ;;  %s2139_s30 = scalar_lea.hbm %s3103_s10, 4096 }
 0x31f   : > { %p2136_p4 = scmp.ne.s32.totalorder %s3046_s12, %s2135_s26  ;;  %p2140_p9 = scmp.lt.s32.totalorder %s3046_s12, %s3103_s10 }
 0x320   : > { %p2141_p10 = scmp.lt.s32.totalorder %s2139_s30, %s2135_s26 }
 0x321   : > { %p2137_p7 = pnand %p2136_p4, %p2280_p5 }
 0x322   : > { %p2142_p11 = por %p2141_p10, %p2140_p9 }
 0x323   : > { %p2138_p8 = pneg %p2137_p7 }
 0x325   : > { %p2143_p12 = pnand %p2142_p11, %p2138_p8 }
 0x327   : > { %2146 = shalt.err (!%p2143_p12)
}
 0x328   : > { %s2185_s17 = smov 128   ;;  %s2186_s20 = smov 8  }
 0x329   : > { %2039 = dma.vmem_to_hbm [thread:$0]  (%p2280_p5), %s3048_s22, 2048, %s3046_s12, %s3053_s18, %s2185_s17, %s2185_s17, %s2186_s20  }
 0x32a PF: > { %p2045_p13 = scmp.ge.s32.totalorder %s2181_s16, 2  ;;  %s1721_s21 = sand.u32 1, %s2169_s13  }
 0x32b   : > { %s1722_s25 = scalar_lea.sflag [#allocation3], %s1721_s21 }
 0x32c   : > { %p2042_p0 = pnand %p2045_p13, %p2284_p6 }
 0x32e   : > { %p2043_p1 = pneg %p2042_p0 }
 0x330   : > { %2164 = dma.done.wait (%p2043_p1), %s1722_s25, 2048  }
 0x331   : > { %2166 = vsyncadd (%p2043_p1), %s1722_s25, 4294965248  ;;  %s3141_s26 = sld [smem:[#allocation5_spill]]  ;;  %p20_p2 = scmp.ge.s32.totalorder %s2267_s19, 4  }
 0x332   : > { %s3142_s13 = smov %s2173_s14  ;;  %s3143_s14 = smov %s2177_s15 }
 0x333   : > { %s3145_s16 = smov %s2267_s19  ;;  %22 = sbr.rel (!%p20_p2) target bundleno = 3 (0x3), region = 95 }
 0x337   : > { %s3144_s15 = smov %s3141_s26 }
 0x338   :  { %1727 = vsyncpa [#allocation3], 1 }
 0x339   :  { %1729 = vsyncpa [#allocation3 + $0x1], 1 }

</bundles_post_ra>
